<compile_context>
chip_gen: v6e
topology: v6e:2x2x1
jax: 0.10.0
libtpu: 0.0.40
codegen_flags: <defaults>
</compile_context>

<pallas_src>
import itertools
import numpy as np
import jax
import jax.numpy as jnp
from jax.experimental import pallas as pl
from jax.experimental.pallas import tpu as pltpu


def anfis_kernel(xa_ref, w_ref, coeff_ref, y_ref, feat_ref):
    """Fused ANFIS forward for one batch tile (batch on the lane axis).

    xa_ref   : (nf, TB)       rows [0,n_in) = x.T, row n_in = 1, rest 0
    w_ref    : (Rp, 2*nf)     folded log-fuzzifier: cols [0,nf) quadratic,
                              cols [nf,2*nf) linear (+ constant at nf+n_in)
    coeff_ref: (n_out+1, Rp)  transposed TSK coefficients + ones row
                              (zero on padded rule columns)
    y_ref    : (n_out, TB)    output (transposed)
    feat_ref : (2*nf, TB)     VMEM scratch for the feature matrix
    """
    nf = xa_ref.shape[0]
    xa = xa_ref[...]                                      # (nf, TB) f32

    # Feature matrix [x*x ; x]; the constant term rides on the appended ones
    # row of xa, so the bias is folded into the same single matmul below.
    feat_ref[0:nf, :] = xa * xa
    feat_ref[nf:, :] = xa

    # Fuzzify + antecedent product in log space, one MXU pass:
    #   log_rules[r,b] = sum over MFs selected by rule r of
    #                    -(x[b,i]-mu[i,m])^2 / (2 sigma[i,m]^2)
    log_rules = jnp.dot(w_ref[...], feat_ref[...],
                        preferred_element_type=jnp.float32)    # (Rp, TB)
    rules = jnp.exp(log_rules)     # >0; padded rules give exp(0)=1 but hit
                                   # all-zero coeff columns below.

    # Consequent matmul with the L1 normalization folded in:
    # coeff_ref rows [0,n_out) = coeff.T, row n_out = 1 over real rules
    # => z[n_out, b] = sum_r rules[r, b].
    z = jnp.dot(coeff_ref[...], rules, preferred_element_type=jnp.float32)
    n_out = y_ref.shape[0]
    denom = jnp.maximum(z[n_out:n_out + 1, :], 1e-12)     # F.normalize eps
    y_ref[...] = (z[:n_out, :] * pl.reciprocal(denom, approx=True)
                  ).astype(y_ref.dtype)


def anfis_forward(x, mu, sigma, S, coeff, *, tb_max=2048):
    """Wrapper: fold parameters once, stream batch-on-lane tiles through Pallas.

    x     : (B, n_in)          inputs
    mu    : (n_in, n_mfs)      Gaussian MF centers
    sigma : (n_in, n_mfs)      Gaussian MF widths
    S     : (R, n_in, n_mfs)   0/1 selection matrix (rule r uses MF m of var i)
    coeff : (R, n_out, 1)      TSK consequent coefficients
    """
    B, n_in = x.shape
    R, n_out = coeff.shape[0], coeff.shape[1]

    x = jnp.asarray(x, jnp.float32)
    mu = jnp.asarray(mu, jnp.float32)
    sigma = jnp.asarray(sigma, jnp.float32)
    S = jnp.asarray(S, jnp.float32)

    # ---- Fold fuzzifier + rule products into per-rule polynomial coeffs ----
    inv2s2 = 1.0 / (2.0 * sigma * sigma)                      # (n_in, n_mfs)
    A = -jnp.einsum('rim,im->ri', S, inv2s2)                  # (R, n_in)  x^2
    Bm = jnp.einsum('rim,im->ri', S, 2.0 * mu * inv2s2)       # (R, n_in)  x
    c = -jnp.einsum('rim,im->r', S, mu * mu * inv2s2)         # (R,)       1

    nf = 8 * pl.cdiv(n_in + 1, 8)      # feature rows: x vars + ones row, 8-pad
    Rp = 128 * pl.cdiv(R, 128)         # rule axis padded to full lane width

    # Single fused weight matrix: log_rules = W @ [x*x ; x] with the constant
    # carried by the ones row (column nf + n_in of the linear block).
    W = jnp.zeros((Rp, 2 * nf), jnp.float32)
    W = W.at[:R, :n_in].set(A)
    W = W.at[:R, nf:nf + n_in].set(Bm)
    W = W.at[:R, nf + n_in].set(c)

    # Transposed consequent coeffs + ones row (L1 denominator).  Padded rule
    # columns stay zero (incl. the ones row) so normalization is unaffected.
    CT = jnp.zeros((n_out + 1, Rp), jnp.float32)
    CT = CT.at[:n_out, :R].set(coeff[:, :, 0].astype(jnp.float32).T)
    CT = CT.at[n_out, :R].set(1.0)

    # ---- Batch tiling: big tiles amortize per-grid-step overhead; keep ----
    # ---- >= 2 "parallel" steps (when B allows) so both v7x TCs get work ----
    tb = max(128, 128 * (int(tb_max) // 128))
    while tb > 128 and B <= tb:        # want cdiv(B, tb) >= 2 when possible
        tb //= 2
    Bp = tb * pl.cdiv(B, tb)           # pad batch so every tile is full

    # Transposed, ones-augmented, zero-padded input (batch on lanes).
    xa = jnp.zeros((nf, Bp), jnp.float32)
    xa = xa.at[:n_in, :B].set(x.T)
    xa = xa.at[n_in, :].set(1.0)

    grid = (Bp // tb,)
    flops = 2 * Bp * (2 * nf * Rp + Rp * (n_out + 1)) + 2 * Bp * (nf + n_out)
    bytes_accessed = 4 * (Bp * nf + Bp * n_out + Rp * 2 * nf + Rp * (n_out + 1))

    yT = pl.pallas_call(
        anfis_kernel,
        out_shape=jax.ShapeDtypeStruct((n_out, Bp), jnp.float32),
        grid=grid,
        in_specs=[
            pl.BlockSpec((nf, tb), lambda i: (0, i)),        # streamed input
            pl.BlockSpec((Rp, 2 * nf), lambda i: (0, 0)),    # VMEM-resident
            pl.BlockSpec((n_out + 1, Rp), lambda i: (0, 0)),
        ],
        out_specs=pl.BlockSpec((n_out, tb), lambda i: (0, i)),  # lane-dense
        scratch_shapes=[pltpu.VMEM((2 * nf, tb), jnp.float32)],
        compiler_params=pltpu.CompilerParams(
            dimension_semantics=("parallel",)),
        cost_estimate=pl.CostEstimate(
            flops=flops, transcendentals=Bp * Rp,
            bytes_accessed=bytes_accessed),
    )(xa, W, CT)

    return yT[:, :B].T


def anfis_reference(x, mu, sigma, combinations, sub_rules, coeff):
    """Plain-JAX reference implementing the literal gather + product semantics."""
    fuzz = jnp.exp(-(x[:, :, None] - mu[None]) ** 2 / (2.0 * sigma[None] ** 2))
    rule_sets = []
    for comb, subset in zip(combinations, sub_rules):
        factors = []
        for j, v in enumerate(comb):
            factors.append(fuzz[:, v, :][:, subset[:, j]])      # (B, n_sub)
        rule_sets.append(jnp.prod(jnp.stack(factors, axis=-1), axis=-1))
    rules = jnp.concatenate(rule_sets, axis=1)
    w = rules / jnp.maximum(jnp.sum(jnp.abs(rules), axis=1, keepdims=True), 1e-12)
    return w @ coeff[:, :, 0]


if __name__ == "__main__":
    # Small configuration consistent with AnfisNet.__init__
    n_cases, n_in, n_mfs, n_out = 256, 4, 3, 2
    combinations = [(0, 1), (2, 3)]

    key = jax.random.PRNGKey(0)
    kx, kc = jax.random.split(key)
    x = jax.random.normal(kx, (n_cases, n_in), dtype=jnp.float32)

    # Deterministic Gaussian MF parameters (GaussMembFunc(mu, sigma) per var/MF)
    mu = np.stack(
        [np.linspace(-1.0, 1.0, n_mfs) + 0.1 * i for i in range(n_in)]
    ).astype(np.float32)                                    # (n_in, n_mfs)
    sigma = np.stack(
        [np.full(n_mfs, 0.6 + 0.05 * i) for i in range(n_in)]
    ).astype(np.float32)                                    # (n_in, n_mfs)

    # AntecedentLayer.sub_rules: all MF-index tuples per combination
    mf_count = [n_mfs] * n_in
    sub_rules = [
        np.array(list(itertools.product(*[range(mf_count[v]) for v in comb])),
                 dtype=np.int32)
        for comb in combinations
    ]
    n_rules = int(sum(len(s) for s in sub_rules))           # 9 + 9 = 18

    # ConsequentLayer coeff: (n_rules, n_out, 1) — synthetic deterministic init
    # (the module's default is zeros; random values make outputs non-trivial)
    coeff = jax.random.normal(kc, (n_rules, n_out, 1), dtype=jnp.float32)

    # Static 0/1 selection matrix S[r, i, m] = 1 iff rule r uses MF m of var i
    S = np.zeros((n_rules, n_in, n_mfs), dtype=np.float32)
    r = 0
    for comb, subset in zip(combinations, sub_rules):
        for tup in subset:
            for v, m in zip(comb, tup):
                S[r, v, m] = 1.0
            r += 1

    y = anfis_forward(x, jnp.asarray(mu), jnp.asarray(sigma), jnp.asarray(S),
                      coeff)
    y = jax.block_until_ready(y)

    y_ref = anfis_reference(x, jnp.asarray(mu), jnp.asarray(sigma),
                            combinations, sub_rules, coeff)
    np.testing.assert_allclose(np.asarray(y), np.asarray(y_ref),
                               rtol=2e-2, atol=1e-3)

    print("KERNEL_OK")
</pallas_src>

<mosaic_0001>
module attributes {stable_mosaic.version = 11 : i64} {
  func.func @anfis_kernel(%arg0: i32, %arg1: memref<8x128xf32, #tpu.memory_space<vmem>>, %arg2: memref<128x16xf32, #tpu.memory_space<vmem>>, %arg3: memref<3x128xf32, #tpu.memory_space<vmem>>, %arg4: memref<2x128xf32, #tpu.memory_space<vmem>>, %arg5: memref<16x128xf32, #tpu.memory_space<vmem>>) attributes {dimension_semantics = [#tpu.dimension_semantics<parallel>], iteration_bounds = array<i64: 2>, scalar_prefetch = 0 : i64, scratch_operands = 1 : i64, tpu.core_type = #tpu.core_type<tc>, window_params = [{transform_indices = @transform_0, window_bounds = array<i64: 8, 128>}, {pipeline_mode = #tpu.pipeline_mode<synchronous>, transform_indices = @transform_1, window_bounds = array<i64: 128, 16>}, {pipeline_mode = #tpu.pipeline_mode<synchronous>, transform_indices = @transform_2, window_bounds = array<i64: 3, 128>}, {transform_indices = @transform_3, window_bounds = array<i64: 2, 128>}]} {
    %c0 = arith.constant 0 : index
    %c0_0 = arith.constant 0 : index
    %0 = vector.load %arg1[%c0, %c0_0] : memref<8x128xf32, #tpu.memory_space<vmem>>, vector<8x128xf32>
    %1 = arith.mulf %0, %0 : vector<8x128xf32>
    %c0_1 = arith.constant 0 : index
    %c0_2 = arith.constant 0 : index
    %2 = vector.load %arg5[%c0_1, %c0_2] : memref<16x128xf32, #tpu.memory_space<vmem>>, vector<8x128xf32>
    tpu.vector_store %arg5[%c0_1, %c0_2], %1 {strides = array<i32>} : memref<16x128xf32, #tpu.memory_space<vmem>>, vector<8x128xf32>,
    %c8 = arith.constant 8 : index
    %c0_3 = arith.constant 0 : index
    %3 = vector.load %arg5[%c8, %c0_3] : memref<16x128xf32, #tpu.memory_space<vmem>>, vector<8x128xf32>
    tpu.vector_store %arg5[%c8, %c0_3], %0 {strides = array<i32>} : memref<16x128xf32, #tpu.memory_space<vmem>>, vector<8x128xf32>,
    %c0_4 = arith.constant 0 : index
    %c0_5 = arith.constant 0 : index
    %4 = vector.load %arg2[%c0_4, %c0_5] : memref<128x16xf32, #tpu.memory_space<vmem>>, vector<128x16xf32>
    %c0_6 = arith.constant 0 : index
    %c0_7 = arith.constant 0 : index
    %5 = vector.load %arg5[%c0_6, %c0_7] : memref<16x128xf32, #tpu.memory_space<vmem>>, vector<16x128xf32>
    %cst = arith.constant dense<0.000000e+00> : vector<128x128xf32>
    %6 = tpu.matmul %4, %5, %cst {dimension_numbers = #tpu.dot_dimension_numbers<[1], [0], [0], [1], [0, 0, 1, 1], [], []>} : vector<128x16xf32>, vector<16x128xf32>, vector<128x128xf32> -> vector<128x128xf32>
    %7 = math.exp %6 : vector<128x128xf32>
    %c0_8 = arith.constant 0 : index
    %c0_9 = arith.constant 0 : index
    %8 = vector.load %arg3[%c0_8, %c0_9] : memref<3x128xf32, #tpu.memory_space<vmem>>, vector<3x128xf32>
    %cst_10 = arith.constant dense<0.000000e+00> : vector<3x128xf32>
    %9 = tpu.matmul %8, %7, %cst_10 {dimension_numbers = #tpu.dot_dimension_numbers<[1], [0], [0], [1], [0, 0, 1, 1], [], []>} : vector<3x128xf32>, vector<128x128xf32>, vector<3x128xf32> -> vector<3x128xf32>
    %10 = vector.extract_strided_slice %9 {offsets = [2, 0], sizes = [1, 128], strides = [1, 1]} : vector<3x128xf32> to vector<1x128xf32>
    %cst_11 = arith.constant 9.99999996E-13 : f32
    %11 = vector.broadcast %cst_11 : f32 to vector<1x128xf32>
    %12 = arith.maximumf %10, %11 : vector<1x128xf32>
    %13 = vector.extract_strided_slice %9 {offsets = [0, 0], sizes = [2, 128], strides = [1, 1]} : vector<3x128xf32> to vector<2x128xf32>
    %14 = tpu.reciprocal %12 {approx = true} : vector<1x128xf32> -> vector<1x128xf32>
    %15 = vector.broadcast %14 : vector<1x128xf32> to vector<2x128xf32>
    %16 = arith.mulf %13, %15 : vector<2x128xf32>
    %c0_12 = arith.constant 0 : index
    %c0_13 = arith.constant 0 : index
    %17 = vector.load %arg4[%c0_12, %c0_13] : memref<2x128xf32, #tpu.memory_space<vmem>>, vector<2x128xf32>
    tpu.vector_store %arg4[%c0_12, %c0_13], %16 {strides = array<i32>} : memref<2x128xf32, #tpu.memory_space<vmem>>, vector<2x128xf32>,
    return
  }
  func.func @transform_0(%arg0: i32) -> (i32, i32) {
    %c0_i32 = arith.constant 0 : i32
    %c0_i32_0 = arith.constant 0 : i32
    return %c0_i32, %arg0 : i32, i32
  }
  func.func @transform_1(%arg0: i32) -> (i32, i32) {
    %c0_i32 = arith.constant 0 : i32
    %c0_i32_0 = arith.constant 0 : i32
    %c0_i32_1 = arith.constant 0 : i32
    return %c0_i32, %c0_i32_0 : i32, i32
  }
  func.func @transform_2(%arg0: i32) -> (i32, i32) {
    %c0_i32 = arith.constant 0 : i32
    %c0_i32_0 = arith.constant 0 : i32
    %c0_i32_1 = arith.constant 0 : i32
    return %c0_i32, %c0_i32_0 : i32, i32
  }
  func.func @transform_3(%arg0: i32) -> (i32, i32) {
    %c0_i32 = arith.constant 0 : i32
    %c0_i32_0 = arith.constant 0 : i32
    return %c0_i32, %arg0 : i32, i32
  }
}

</mosaic_0001>

<bundles_post_ra>
// kernel: tpu_custom_call.1
= control target key start
LH: loop header
LB: loop body
LE: loop exit
PB: predicated region body
PF: predicated region fallthrough
CT: control target
= control target key end

     0   :  { %8 = vsyncpa [#allocation4], 0  ;;  %s1021_s0 = inlined_call_operand.vmem [shape: f32[8,256], index: 0, kind: input, shape index: {}]   ;;  %s1022_s1 = inlined_call_operand.vmem [shape: f32[128,16], index: 1, kind: input, shape index: {}]   ;;  %s1023_s2 = inlined_call_operand.vmem [shape: f32[3,128], index: 2, kind: input, shape index: {}]   ;;  %s1024_s3 = inlined_call_operand.hbm [shape: f32[2,256], index: 3, kind: output, shape index: {}]  }
   0x1   :  { %10 = vsyncpa [#allocation4 + $0x1], 0  ;;  %s850_s12 = smov 0   ;;  %s852_s13 = smov 0  }
   0x2   :  { %s854_s14 = smov 0   ;;  %s856_s15 = smov 0  }
   0x3 LB: > { %s871_s16 = sadd.s32 4294967295, %s825_s15   ;;  %s566_s17 = sadd.s32 4294967294, %s825_s15   ;;  %s825_s15 = sphi %s856_s15, %s1030_s15   ;;  %s821_s14 = sphi %s854_s14, %s1029_s14   ;;  %s817_s13 = sphi %s852_s13, %s1028_s13   ;;  %s813_s12 = sphi %s850_s12, %s1027_s12  }
   0x4   : > { %s875_s18 = sadd.s32 1, %s825_s15   ;;  %s91_s19 = sadd.s32 1, %s821_s14 }
   0x5   : > { %s88_s20 = ssub.s32 %s825_s15, %s875_s18  ;;  %p101_p0 = scmp.ne.s32.totalorder %s821_s14, %s817_s13 }
   0x6   : > { %p89_p1 = scmp.eq.s32.totalorder %s88_s20, 0  ;;  %p102_p2 = scmp.eq.s32.totalorder %s871_s16, 1 }
   0x7   : > { %p107_p3 = scmp.ne.s32.totalorder %s817_s13, %s813_s12  ;;  %p108_p4 = scmp.eq.s32.totalorder %s566_s17, 1 }
   0x8   : > { %s886_s21 = scalar_select %p89_p1, %s821_s14, %s91_s19  }
   0x9   : > { %p888_p5 = por %p102_p2, %p101_p0  ;;  %p892_p6 = por %p108_p4, %p107_p3 }
   0xa   : > { %p569_p7 = scmp.ge.s32.totalorder %s825_s15, 1  ;;  %p139_p8 = scmp.lt.s32.totalorder %s825_s15, 3 }
   0xc   : > { %p140_p9 = pnand %p569_p7, %p139_p8 }
   0xd   : > { %p162_p10 = scmp.lt.s32.totalorder (!%p140_p9), %s871_s16, 1  ;;  %s589_s29 = sshll.u32 (!%p140_p9), %s871_s16, 5 }
   0xe   : > { %143 = sbr.rel (%p140_p9) target bundleno = 522 (0x20a), region = 32  ;;  %s505_s7 = scalar_lea.hbm (!%p140_p9), %s1024_s3, %s589_s29 }
   0xf   : > { %s829_s10 = smov (!%p140_p9), [#allocation3]  }
  0x10   : > { %s769_s11 = sshll.u32 (!%p140_p9), %s829_s10, 4  ;;  %s770_s11 = int_to_ptr.vmem [resolvable:$false] %s769_s11 }
  0x13   : > { %v170_v0 = vld [vmem:[%s1022_s1] sm:$0xff]  ;;  %vm188_vm0 = vcmask 130048   ;;  %s163_s26 = scalar_select %p162_p10, %s871_s16, 1  ;;  %v171_v3 = vld [vmem:[%s1022_s1 + $0x8] sm:$0xff]  ;;  %v172_v4 = vld [vmem:[%s1022_s1 + $0x10] sm:$0xff]  ;;  %v827_v18 = vmov 0.0  }
  0x14   : > { %631 = vmatprep.mubr.msk.f32.mxu0 %vm188_vm0, %v170_v0  ;;  %v173_v5 = vld [vmem:[%s1022_s1 + $0x18] sm:$0xff]  ;;  %v174_v6 = vld [vmem:[%s1022_s1 + $0x20] sm:$0xff]  ;;  %v175_v7 = vld [vmem:[%s1022_s1 + $0x28] sm:$0xff]  ;;  %655 = vmatprep.subr.mxu1 %v827_v18  ;;  %vm828_vm1 = vmmov 0   ;;  %s771_s16 = scalar_lea.vmem %s770_s11, 64 }
  0x15   : > { %s571_s27 = sshll.u32 %s163_s26, 3  ;;  %v176_v8 = vld [vmem:[%s1022_s1 + $0x30] sm:$0xff]  ;;  %v177_v9 = vld [vmem:[%s1022_s1 + $0x38] sm:$0xff]  ;;  %v178_v10 = vld [vmem:[%s1022_s1 + $0x40] sm:$0xff]  ;;  %687 = vmatprep.mubr.msk.f32.mxu1 %vm828_vm1, %v827_v18 }
  0x16   : > { %s165_s30 = scalar_lea.vmem %s1021_s0, %s571_s27  ;;  %v179_v11 = vld [vmem:[%s1022_s1 + $0x48] sm:$0xff]  ;;  %v180_v12 = vld [vmem:[%s1022_s1 + $0x50] sm:$0xff]  ;;  %v181_v13 = vld [vmem:[%s1022_s1 + $0x58] sm:$0xff]  ;;  %s159_s27 = sand.u32 1, %s817_s13  }
  0x17   : > { %v166_v1 = vld [vmem:[%s165_s30] sm:$0xff]  ;;  %v183_v15 = vld [vmem:[%s1022_s1 + $0x68] sm:$0xff]  ;;  %v184_v16 = vld [vmem:[%s1022_s1 + $0x70] sm:$0xff]  ;;  %s570_s28 = sshll.u32 %s159_s27, 1  ;;  %s494_s8 = scalar_lea.sflag [#allocation4], %s159_s27 }
  0x18   : > { %627 = vmatprep.subr.mxu0 %v166_v1  ;;  %v167_v2 = vmul.f32 %v166_v1, %v166_v1  ;;  %v182_v14 = vld [vmem:[%s1022_s1 + $0x60] sm:$0xff]  ;;  %v185_v17 = vld [vmem:[%s1022_s1 + $0x78] sm:$0xff]  ;;  %s161_s30 = scalar_lea.vmem [#allocation3], %s570_s28 }
  0x19   : > { %628 = vmatpush3.msra.mxu0 %v166_v1  ;;  %s507_s4 = sshll.u32 %s161_s30, 4  ;;  %s508_s4 = int_to_ptr.vmem [resolvable:$true] %s507_s4 }
  0x1a   : > { %629 = vmatprep.subr.mxu0 %v167_v2  ;;  %s765_s9 = scalar_lea.vmem %s508_s4, 32  ;;  %p772_p0 = scmp.lt.s32.totalorder %s508_s4, %s770_s11 }
  0x1b   : > { %630 = vmatpush3.msra.mxu0 %v167_v2  ;;  %v414_v2 = vld [vmem:[%s1023_s2] sm:$0x7]  ;;  %p766_p11 = scmp.ne.s32.totalorder %s508_s4, %s765_s9  ;;  %p773_p1 = scmp.lt.s32.totalorder %s771_s16, %s765_s9 }
  0x1c   : > { %632 = vmatmul.mubr.msk.f32.vlgmr.msra.gmra.mxu0 %vm188_vm0, %v171_v3 }
  0x1d   : > { %634 = vmatprep.mubr.msk.f32.mxu0 %vm188_vm0, %v172_v4  ;;  %p767_p12 = pnand %p766_p11, %p888_p5  ;;  %p774_p2 = por %p773_p1, %p772_p0 }
  0x1f   : > { %p768_p13 = pneg %p767_p12 }
  0x20   : > { %635 = vmatmul.mubr.msk.f32.gmra.mxu0 %vm188_vm0, %v173_v5 }
  0x21   : > { %637 = vmatprep.mubr.msk.f32.mxu0 %vm188_vm0, %v174_v6  ;;  %p775_p3 = pnand %p774_p2, %p768_p13 }
  0x24   : > { %638 = vmatmul.mubr.msk.f32.gmra.mxu0 %vm188_vm0, %v175_v7  ;;  %v487_v7 = vlaneseq }
  0x25   : > { %640 = vmatprep.mubr.msk.f32.mxu0 %vm188_vm0, %v176_v8 }
  0x26   : > { %v488_v8 = vshrl.u32 %v487_v7, 7 }
  0x28   : > { %641 = vmatmul.mubr.msk.f32.gmra.mxu0 %vm188_vm0, %v177_v9  ;;  %v489_v9 = vsub.s32 2, %v488_v8 }
  0x29   : > { %643 = vmatprep.mubr.msk.f32.mxu0 %vm188_vm0, %v178_v10 }
  0x2c   : > { %644 = vmatmul.mubr.msk.f32.gmra.mxu0 %vm188_vm0, %v179_v11 }
  0x2d   : > { %646 = vmatprep.mubr.msk.f32.mxu0 %vm188_vm0, %v180_v12 }
  0x30   : > { %647 = vmatmul.mubr.msk.f32.gmra.mxu0 %vm188_vm0, %v181_v13 }
  0x31   : > { %649 = vmatprep.mubr.msk.f32.mxu0 %vm188_vm0, %v182_v14 }
  0x34   : > { %650 = vmatmul.mubr.msk.f32.gmra.mxu0 %vm188_vm0, %v183_v15 }
  0x35   : > { %652 = vmatprep.mubr.msk.f32.mxu0 %vm188_vm0, %v184_v16 }
  0x38   : > { %653 = vmatmul.mubr.msk.f32.gmra.mxu0 %vm188_vm0, %v185_v17 }
  0xdc   : > { %v633_v19 = vpop.f32.mrf.mxu0 }
  0xdd   : > { %v384_v55 = vmul.f32 1.442695, %v633_v19 }
  0xde   : > { %v303_v20 = vpop.f32.mrf.mxu0 }
  0xdf   : > { %v382_v57 = vmul.f32 1.442695, %v303_v20 }
  0xe0   : > { %v636_v21 = vpop.f32.mrf.mxu0 }
  0xe1   : > { %v388_v51 = vmul.f32 1.442695, %v636_v21 }
  0xe2   : > { %v313_v22 = vpop.f32.mrf.mxu0 }
  0xe3   : > { %v386_v53 = vmul.f32 1.442695, %v313_v22 }
  0xe4   : > { %v639_v23 = vpop.f32.mrf.mxu0 }
  0xe5   : > { %v392_v47 = vmul.f32 1.442695, %v639_v23 }
  0xe6   : > { %v323_v24 = vpop.f32.mrf.mxu0 }
  0xe7   : > { %v390_v49 = vmul.f32 1.442695, %v323_v24 }
  0xe8   : > { %v642_v25 = vpop.f32.mrf.mxu0 }
  0xe9   : > { %v396_v43 = vmul.f32 1.442695, %v642_v25 }
  0xea   : > { %v333_v26 = vpop.f32.mrf.mxu0 }
  0xeb   : > { %v394_v45 = vmul.f32 1.442695, %v333_v26 }
  0xec   : > { %v645_v27 = vpop.f32.mrf.mxu0 }
  0xed   : > { %v400_v41 = vmul.f32 1.442695, %v645_v27 }
  0xee   : > { %v343_v28 = vpop.f32.mrf.mxu0 }
  0xef   : > { %v398_v42 = vmul.f32 1.442695, %v343_v28 }
  0xf0   : > { %v648_v29 = vpop.f32.mrf.mxu0 }
  0xf1   : > { %v404_v39 = vmul.f32 1.442695, %v648_v29 }
  0xf2   : > { %v353_v30 = vpop.f32.mrf.mxu0 }
  0xf3   : > { %v402_v40 = vmul.f32 1.442695, %v353_v30 }
  0xf4   : > { %v651_v31 = vpop.f32.mrf.mxu0 }
  0xf5   : > { %v408_v36 = vmul.f32 1.442695, %v651_v31 }
  0xf6   : > { %v363_v32 = vpop.f32.mrf.mxu0 }
  0xf7   : > { %v406_v38 = vmul.f32 1.442695, %v363_v32 }
  0xf8   : > { %v654_v33 = vpop.f32.mrf.mxu0 }
  0xf9   : > { %v412_v34 = vmul.f32 1.442695, %v654_v33 }
  0xfa   : > { %v373_v35 = vpop.f32.mrf.mxu0 }
  0xfb   : > { %731 = vpow2.f32 %v412_v34  ;;  %v410_v37 = vmul.f32 1.442695, %v373_v35 }
  0xfd   : > { %733 = vpow2.f32 %v410_v37 }
  0xfe   : > { %735 = vpow2.f32 %v408_v36 }
  0xff   : > { %737 = vpow2.f32 %v406_v38 }
 0x100   : > { %739 = vpow2.f32 %v404_v39 }
 0x101   : > { %741 = vpow2.f32 %v402_v40 }
 0x102   : > { %743 = vpow2.f32 %v400_v41 }
 0x103   : > { %745 = vpow2.f32 %v398_v42 }
 0x104   : > { %747 = vpow2.f32 %v396_v43 }
 0x105   : > { %749 = vpow2.f32 %v394_v45 }
 0x106   : > { %751 = vpow2.f32 %v392_v47 }
 0x107   : > { %753 = vpow2.f32 %v390_v49 }
 0x108   : > { %v732_v44 = vpop.eup %731  ;;  %755 = vpow2.f32 %v388_v51 }
 0x109   : > { %656 = vmatpush3.msra.mxu1 %v732_v44  ;;  %757 = vpow2.f32 %v386_v53 }
 0x10a   : > { %v734_v46 = vpop.eup %733  ;;  %657 = vmatprep.subr.mxu1 %v827_v18  ;;  %759 = vpow2.f32 %v384_v55 }
 0x10b   : > { %658 = vmatpush3.msra.mxu1 %v734_v46  ;;  %v736_v48 = vpop.eup %735  ;;  %761 = vpow2.f32 %v382_v57 }
 0x10c   : > { %659 = vmatprep.subr.mxu1 %v827_v18  ;;  %v738_v50 = vpop.eup %737 }
 0x10d   : > { %660 = vmatpush3.msra.mxu1 %v736_v48  ;;  %v740_v52 = vpop.eup %739 }
 0x10e   : > { %661 = vmatprep.subr.mxu1 %v827_v18  ;;  %v742_v54 = vpop.eup %741 }
 0x10f   : > { %662 = vmatpush3.msra.mxu1 %v738_v50  ;;  %v744_v56 = vpop.eup %743 }
 0x110   : > { %663 = vmatprep.subr.mxu1 %v827_v18  ;;  %v746_v58 = vpop.eup %745 }
 0x111   : > { %664 = vmatpush3.msra.mxu1 %v740_v52  ;;  %v748_v59 = vpop.eup %747 }
 0x112   : > { %665 = vmatprep.subr.mxu1 %v827_v18  ;;  %v750_v60 = vpop.eup %749 }
 0x113   : > { %666 = vmatpush3.msra.mxu1 %v742_v54  ;;  %v752_v61 = vpop.eup %751 }
 0x114   : > { %667 = vmatprep.subr.mxu1 %v827_v18  ;;  %v754_v62 = vpop.eup %753 }
 0x115   : > { %668 = vmatpush3.msra.mxu1 %v744_v56  ;;  %v756_v63 = vpop.eup %755 }
 0x116   : > { %669 = vmatprep.subr.mxu1 %v827_v18  ;;  %v758_v0 = vpop.eup %757 }
 0x117   : > { %670 = vmatpush3.msra.mxu1 %v746_v58  ;;  %v760_v1 = vpop.eup %759 }
 0x118   : > { %671 = vmatprep.subr.mxu1 %v827_v18  ;;  %v762_v3 = vpop.eup %761 }
 0x119   : > { %672 = vmatpush3.msra.mxu1 %v748_v59 }
 0x11a   : > { %673 = vmatprep.subr.mxu1 %v827_v18 }
 0x11b   : > { %674 = vmatpush3.msra.mxu1 %v750_v60 }
 0x11c   : > { %675 = vmatprep.subr.mxu1 %v827_v18 }
 0x11d   : > { %676 = vmatpush3.msra.mxu1 %v752_v61 }
 0x11e   : > { %677 = vmatprep.subr.mxu1 %v827_v18 }
 0x11f   : > { %678 = vmatpush3.msra.mxu1 %v754_v62 }
 0x120   : > { %679 = vmatprep.subr.mxu1 %v827_v18 }
 0x121   : > { %680 = vmatpush3.msra.mxu1 %v756_v63 }
 0x122   : > { %681 = vmatprep.subr.mxu1 %v827_v18 }
 0x123   : > { %682 = vmatpush3.msra.mxu1 %v758_v0 }
 0x124   : > { %683 = vmatprep.subr.mxu1 %v827_v18 }
 0x125   : > { %684 = vmatpush3.msra.mxu1 %v760_v1 }
 0x126   : > { %685 = vmatprep.subr.mxu1 %v827_v18 }
 0x127   : > { %686 = vmatpush3.msra.mxu1 %v762_v3 }
 0x128   : > { %688 = vmatmul.mubr.f32.vlgmr.msra.gmra.mxu1 %v414_v2 }
 0x1e8   : > { %v481_v4 = vpop.f32.mrf.mxu1 }
 0x1e9   : > { %v485_v5 = vmax.f32 %v481_v4, 1e-12 }
 0x1ea   : > { %v689_v6 = vpop.f32.mrf.mxu1 }
 0x1eb   : > { %763 = vrcp.f32 %v485_v5 }
 0x1f8   : > { %v764_v10 = vpop.eup %763 }
 0x1f9   : > { %v490_v11 = vrot.slane %v764_v10, %v489_v9 }
 0x1fb   : > { %v491_v12 = vmul.f32 %v490_v11, %v481_v4 }
 0x1fd   : > { %492 = vst [vmem:[%s161_s30] sm:$0x3] %v491_v12 }
 0x1fe   : > { %778 = shalt.err (!%p775_p3)
}
 0x1ff   : > { %s779_s17 = scalar_lea.hbm %s505_s7, 32  ;;  %s783_s24 = scalar_lea.hbm %s1024_s3, 64 }
 0x200   : > { %p780_p4 = scmp.ne.s32.totalorder %s505_s7, %s779_s17  ;;  %p784_p9 = scmp.lt.s32.totalorder %s505_s7, %s1024_s3 }
 0x201   : > { %p785_p10 = scmp.lt.s32.totalorder %s783_s24, %s779_s17 }
 0x202   : > { %p781_p7 = pnand %p780_p4, %p888_p5 }
 0x203   : > { %p786_p11 = por %p785_p10, %p784_p9 }
 0x204   : > { %p782_p8 = pneg %p781_p7 }
 0x206   : > { %p787_p12 = pnand %p786_p11, %p782_p8 }
 0x208   : > { %790 = shalt.err (!%p787_p12)
}
 0x209   : > { %690 = dma.vmem_to_hbm [thread:$0]  (%p888_p5), %s508_s4, 32, %s505_s7, %s494_s8  }
 0x20a PF: > { %p696_p13 = scmp.ge.s32.totalorder %s825_s15, 2  ;;  %s519_s27 = sand.u32 1, %s813_s12  }
 0x20b   : > { %s520_s28 = scalar_lea.sflag [#allocation4], %s519_s27 }
 0x20c   : > { %p693_p0 = pnand %p696_p13, %p892_p6 }
 0x20e   : > { %p694_p1 = pneg %p693_p0 }
 0x210   : > { %808 = dma.done.wait (%p694_p1), %s520_s28, 32  }
 0x211   : > { %810 = vsyncadd (%p694_p1), %s520_s28, 4294967264  ;;  %p13_p2 = scmp.ge.s32.totalorder %s875_s18, 4   ;;  %s1027_s12 = smov %s817_s13 }
 0x212   : > { %s1028_s13 = smov %s821_s14  ;;  %s1029_s14 = smov %s886_s21 }
 0x213   : > { %s1030_s15 = smov %s875_s18  ;;  %15 = sbr.rel (!%p13_p2) target bundleno = 3 (0x3), region = 67 }
 0x218   :  { %525 = vsyncpa [#allocation4], 1 }
 0x219   :  { %527 = vsyncpa [#allocation4 + $0x1], 1 }

</bundles_post_ra>
